<compile_context>
chip_gen: v6e
topology: v6e:2x2x1
jax: 0.10.0
libtpu: 0.0.40
codegen_flags: <defaults>
</compile_context>

<pallas_src>
import jax
import jax.numpy as jnp
from jax.experimental import pallas as pl
from jax.experimental.pallas import tpu as pltpu


def random_agent_kernel(u_ref, coords_ref, out_ref):
    """u_ref, coords_ref, out_ref: (D, tile_B) float32 refs, batch on lanes."""
    d = u_ref.shape[0]

    # Row 0 initializes the running argmax.
    best_val = u_ref[0:1, :] * coords_ref[0:1, :]                 # (1, tile_B)
    best_idx = jnp.zeros(best_val.shape, dtype=jnp.int32)

    # Fully unrolled compare/select over the D sublane rows (pure VPU work).
    for i in range(1, d):
        row = u_ref[i:i + 1, :] * coords_ref[i:i + 1, :]
        take = row > best_val          # strict '>' => first-occurrence tie-break
        best_val = jnp.where(take, row, best_val)
        best_idx = jnp.where(take, i, best_idx)

    # One-hot output, one lane-dense (1, tile_B) row per class.
    for i in range(d):
        out_ref[i:i + 1, :] = (best_idx == i).astype(jnp.float32)


def random_agent_pallas(u, coords, *, tile_b=8192):
    """u, coords: (B, D) arrays. Returns (B, D) float32 one-hot of argmax(u*coords, axis=1)."""
    B, D = coords.shape
    assert u.shape == (B, D)

    # Lane-dense layout: batch on the 128-lane axis.
    u_t = u.astype(jnp.float32).T                                  # (D, B)
    c_t = coords.astype(jnp.float32).T                             # (D, B)

    # Pick a 128-aligned lane tile and pad B up to a multiple of it.
    lanes = 128
    b_ceil = lanes * pl.cdiv(B, lanes)
    tile_b = max(lanes, (min(int(tile_b), b_ceil) // lanes) * lanes)
    b_pad = tile_b * pl.cdiv(B, tile_b)
    if b_pad != B:
        pad = ((0, 0), (0, b_pad - B))
        u_t = jnp.pad(u_t, pad)
        c_t = jnp.pad(c_t, pad)

    spec = pl.BlockSpec((D, tile_b), lambda i: (0, i))
    out_t = pl.pallas_call(
        random_agent_kernel,
        out_shape=jax.ShapeDtypeStruct((D, b_pad), jnp.float32),
        grid=(b_pad // tile_b,),
        in_specs=[spec, spec],
        out_specs=spec,
        compiler_params=pltpu.CompilerParams(
            dimension_semantics=("parallel",)),
    )(u_t, c_t)

    return out_t[:, :B].T                                          # (B, D)


def random_agent_forward(coords, key, *, tile_b=8192):
    """Module-style entry point: draws its own uniforms (torch.rand equivalent)."""
    B, D = coords.shape
    u = jax.random.uniform(key, (B, D), dtype=jnp.float32)
    return random_agent_pallas(u, coords, tile_b=tile_b)


if __name__ == "__main__":
    # Shapes consistent with the module: dimension=4, batch=8
    # (max_num_points is unused in forward).
    dimension = 4
    batch = 8

    key = jax.random.PRNGKey(0)
    k_mask, k_rand, k_fwd = jax.random.split(key, 3)

    # Binary multi-hot "coords" mask as produced by the host in hironaka;
    # guarantee at least one available coordinate per row.
    mask = (jax.random.uniform(k_mask, (batch, dimension)) > 0.5).astype(jnp.float32)
    row_has_one = mask.sum(axis=1, keepdims=True) > 0
    coords = jnp.where(
        row_has_one, mask,
        jax.nn.one_hot(jnp.zeros((batch,), jnp.int32), dimension, dtype=jnp.float32),
    )

    # Draw the uniforms explicitly so we can check the kernel bit-for-bit
    # against the pure-JAX version of the torch formula.
    u = jax.random.uniform(k_rand, (batch, dimension), dtype=jnp.float32)

    out = jax.block_until_ready(random_agent_pallas(u, coords))
    ref = jax.nn.one_hot(jnp.argmax(u * coords, axis=1), dimension, dtype=jnp.float32)

    assert out.shape == (batch, dimension)
    assert out.dtype == jnp.float32
    assert bool(jnp.all(out == ref))
    assert bool(jnp.all(out.sum(axis=1) == 1.0))
    assert bool(jnp.all((out * coords).sum(axis=1) == 1.0))

    # Module-style call that draws its own randoms.
    out2 = jax.block_until_ready(random_agent_forward(coords, k_fwd))
    assert bool(jnp.all(out2.sum(axis=1) == 1.0))
    assert bool(jnp.all((out2 * coords).sum(axis=1) == 1.0))

    print("KERNEL_OK")
</pallas_src>

<mosaic_0001>
module attributes {stable_mosaic.version = 11 : i64} {
  func.func @random_agent_kernel(%arg0: i32, %arg1: memref<4x128xf32, #tpu.memory_space<vmem>>, %arg2: memref<4x128xf32, #tpu.memory_space<vmem>>, %arg3: memref<4x128xf32, #tpu.memory_space<vmem>>) attributes {dimension_semantics = [#tpu.dimension_semantics<parallel>], iteration_bounds = array<i64: 1>, scalar_prefetch = 0 : i64, scratch_operands = 0 : i64, tpu.core_type = #tpu.core_type<tc>, window_params = [{transform_indices = @transform_0, window_bounds = array<i64: 4, 128>}, {transform_indices = @transform_1, window_bounds = array<i64: 4, 128>}, {transform_indices = @transform_2, window_bounds = array<i64: 4, 128>}]} {
    %c0 = arith.constant 0 : index
    %c0_0 = arith.constant 0 : index
    %0 = vector.load %arg1[%c0, %c0_0] : memref<4x128xf32, #tpu.memory_space<vmem>>, vector<1x128xf32>
    %c0_1 = arith.constant 0 : index
    %c0_2 = arith.constant 0 : index
    %1 = vector.load %arg2[%c0_1, %c0_2] : memref<4x128xf32, #tpu.memory_space<vmem>>, vector<1x128xf32>
    %2 = arith.mulf %0, %1 : vector<1x128xf32>
    %c0_i32 = arith.constant 0 : i32
    %3 = vector.broadcast %c0_i32 : i32 to vector<1x128xi32>
    %c1 = arith.constant 1 : index
    %c0_3 = arith.constant 0 : index
    %4 = vector.load %arg1[%c1, %c0_3] : memref<4x128xf32, #tpu.memory_space<vmem>>, vector<1x128xf32>
    %c1_4 = arith.constant 1 : index
    %c0_5 = arith.constant 0 : index
    %5 = vector.load %arg2[%c1_4, %c0_5] : memref<4x128xf32, #tpu.memory_space<vmem>>, vector<1x128xf32>
    %6 = arith.mulf %4, %5 : vector<1x128xf32>
    %7 = arith.cmpf ogt, %6, %2 : vector<1x128xf32>
    %8 = arith.select %7, %6, %2 : vector<1x128xi1>, vector<1x128xf32>
    %c1_i32 = arith.constant 1 : i32
    %9 = vector.broadcast %c1_i32 : i32 to vector<1x128xi32>
    %10 = arith.select %7, %9, %3 : vector<1x128xi1>, vector<1x128xi32>
    %c2 = arith.constant 2 : index
    %c0_6 = arith.constant 0 : index
    %11 = vector.load %arg1[%c2, %c0_6] : memref<4x128xf32, #tpu.memory_space<vmem>>, vector<1x128xf32>
    %c2_7 = arith.constant 2 : index
    %c0_8 = arith.constant 0 : index
    %12 = vector.load %arg2[%c2_7, %c0_8] : memref<4x128xf32, #tpu.memory_space<vmem>>, vector<1x128xf32>
    %13 = arith.mulf %11, %12 : vector<1x128xf32>
    %14 = arith.cmpf ogt, %13, %8 : vector<1x128xf32>
    %15 = arith.select %14, %13, %8 : vector<1x128xi1>, vector<1x128xf32>
    %c2_i32 = arith.constant 2 : i32
    %16 = vector.broadcast %c2_i32 : i32 to vector<1x128xi32>
    %17 = arith.select %14, %16, %10 : vector<1x128xi1>, vector<1x128xi32>
    %c3 = arith.constant 3 : index
    %c0_9 = arith.constant 0 : index
    %18 = vector.load %arg1[%c3, %c0_9] : memref<4x128xf32, #tpu.memory_space<vmem>>, vector<1x128xf32>
    %c3_10 = arith.constant 3 : index
    %c0_11 = arith.constant 0 : index
    %19 = vector.load %arg2[%c3_10, %c0_11] : memref<4x128xf32, #tpu.memory_space<vmem>>, vector<1x128xf32>
    %20 = arith.mulf %18, %19 : vector<1x128xf32>
    %21 = arith.cmpf ogt, %20, %15 : vector<1x128xf32>
    %c3_i32 = arith.constant 3 : i32
    %22 = vector.broadcast %c3_i32 : i32 to vector<1x128xi32>
    %23 = arith.select %21, %22, %17 : vector<1x128xi1>, vector<1x128xi32>
    %c0_i32_12 = arith.constant 0 : i32
    %24 = vector.broadcast %c0_i32_12 : i32 to vector<1x128xi32>
    %25 = arith.cmpi eq, %23, %24 : vector<1x128xi32>
    %26 = arith.extui %25 : vector<1x128xi1> to vector<1x128xi32>
    %27 = arith.sitofp %26 : vector<1x128xi32> to vector<1x128xf32>
    %c0_13 = arith.constant 0 : index
    %c0_14 = arith.constant 0 : index
    %28 = vector.load %arg3[%c0_13, %c0_14] : memref<4x128xf32, #tpu.memory_space<vmem>>, vector<1x128xf32>
    tpu.vector_store %arg3[%c0_13, %c0_14], %27 {strides = array<i32>} : memref<4x128xf32, #tpu.memory_space<vmem>>, vector<1x128xf32>,
    %c1_i32_15 = arith.constant 1 : i32
    %29 = vector.broadcast %c1_i32_15 : i32 to vector<1x128xi32>
    %30 = arith.cmpi eq, %23, %29 : vector<1x128xi32>
    %31 = arith.extui %30 : vector<1x128xi1> to vector<1x128xi32>
    %32 = arith.sitofp %31 : vector<1x128xi32> to vector<1x128xf32>
    %c1_16 = arith.constant 1 : index
    %c0_17 = arith.constant 0 : index
    %33 = vector.load %arg3[%c1_16, %c0_17] : memref<4x128xf32, #tpu.memory_space<vmem>>, vector<1x128xf32>
    tpu.vector_store %arg3[%c1_16, %c0_17], %32 {strides = array<i32>} : memref<4x128xf32, #tpu.memory_space<vmem>>, vector<1x128xf32>,
    %c2_i32_18 = arith.constant 2 : i32
    %34 = vector.broadcast %c2_i32_18 : i32 to vector<1x128xi32>
    %35 = arith.cmpi eq, %23, %34 : vector<1x128xi32>
    %36 = arith.extui %35 : vector<1x128xi1> to vector<1x128xi32>
    %37 = arith.sitofp %36 : vector<1x128xi32> to vector<1x128xf32>
    %c2_19 = arith.constant 2 : index
    %c0_20 = arith.constant 0 : index
    %38 = vector.load %arg3[%c2_19, %c0_20] : memref<4x128xf32, #tpu.memory_space<vmem>>, vector<1x128xf32>
    tpu.vector_store %arg3[%c2_19, %c0_20], %37 {strides = array<i32>} : memref<4x128xf32, #tpu.memory_space<vmem>>, vector<1x128xf32>,
    %c3_i32_21 = arith.constant 3 : i32
    %39 = vector.broadcast %c3_i32_21 : i32 to vector<1x128xi32>
    %40 = arith.cmpi eq, %23, %39 : vector<1x128xi32>
    %41 = arith.extui %40 : vector<1x128xi1> to vector<1x128xi32>
    %42 = arith.sitofp %41 : vector<1x128xi32> to vector<1x128xf32>
    %c3_22 = arith.constant 3 : index
    %c0_23 = arith.constant 0 : index
    %43 = vector.load %arg3[%c3_22, %c0_23] : memref<4x128xf32, #tpu.memory_space<vmem>>, vector<1x128xf32>
    tpu.vector_store %arg3[%c3_22, %c0_23], %42 {strides = array<i32>} : memref<4x128xf32, #tpu.memory_space<vmem>>, vector<1x128xf32>,
    return
  }
  func.func @transform_0(%arg0: i32) -> (i32, i32) {
    %c0_i32 = arith.constant 0 : i32
    %c0_i32_0 = arith.constant 0 : i32
    return %c0_i32, %arg0 : i32, i32
  }
  func.func @transform_1(%arg0: i32) -> (i32, i32) {
    %c0_i32 = arith.constant 0 : i32
    %c0_i32_0 = arith.constant 0 : i32
    return %c0_i32, %arg0 : i32, i32
  }
  func.func @transform_2(%arg0: i32) -> (i32, i32) {
    %c0_i32 = arith.constant 0 : i32
    %c0_i32_0 = arith.constant 0 : i32
    return %c0_i32, %arg0 : i32, i32
  }
}

</mosaic_0001>

<bundles_post_ra>
// kernel: tpu_custom_call.1
= control target key start
LH: loop header
LB: loop body
LE: loop exit
PB: predicated region body
PF: predicated region fallthrough
CT: control target
= control target key end

     0   :  { %7 = vsyncpa [#allocation3], 0  ;;  %s192_s0 = inlined_call_operand.hbm [shape: f32[4,128], index: 0, kind: input, shape index: {}]   ;;  %s193_s1 = inlined_call_operand.hbm [shape: f32[4,128], index: 1, kind: input, shape index: {}]   ;;  %s194_s2 = inlined_call_operand.hbm [shape: f32[4,128], index: 2, kind: output, shape index: {}]  }
   0x1   :  { %8 = vsyncpa [#allocation6], 0 }
   0x2   :  { %9 = vsyncpa [#allocation4], 0  ;;  %s163_s9 = smov [#allocation2]   ;;  %s164_s11 = smov [#allocation5]  }
   0x3   :  { %s16_s10 = sshll.u32 %s163_s9, 4  ;;  %s26_s12 = sshll.u32 %s164_s11, 4  ;;  %s17_s10 = int_to_ptr.vmem [resolvable:$true] %s16_s10  ;;  %s27_s12 = int_to_ptr.vmem [resolvable:$true] %s26_s12 }
   0x4   :  { %s105_s13 = scalar_lea.vmem %s17_s10, 64  ;;  %p110_p1 = scmp.lt.s32.totalorder %s17_s10, %s17_s10 }
   0x5   :  { %p106_p0 = scmp.ne.s32.totalorder %s17_s10, %s105_s13  ;;  %p111_p2 = scmp.lt.s32.totalorder %s105_s13, %s105_s13 }
   0x7   :  { %p112_p3 = por %p111_p2, %p110_p1 }
   0x9   :  { %p113_p4 = pnand %p112_p3, %p106_p0 }
   0xb   :  { %116 = shalt.err (!%p113_p4)
}
   0xc   :  { %19 = dma.hbm_to_vmem [thread:$0]  %s192_s0, 64, %s17_s10, [#allocation3]  }
   0xd   :  { %s125_s16 = scalar_lea.vmem %s27_s12, 64  ;;  %p130_p6 = scmp.lt.s32.totalorder %s27_s12, %s27_s12 }
   0xe   :  { %p126_p5 = scmp.ne.s32.totalorder %s27_s12, %s125_s16  ;;  %p131_p7 = scmp.lt.s32.totalorder %s125_s16, %s125_s16 }
  0x10   :  { %p132_p8 = por %p131_p7, %p130_p6 }
  0x12   :  { %p133_p9 = pnand %p132_p8, %p126_p5 }
  0x14   :  { %136 = shalt.err (!%p133_p9)
}
  0x15   :  { %29 = dma.hbm_to_vmem [thread:$0]  %s193_s1, 64, %s27_s12, [#allocation6]  }
  0x16   :  { %157 = dma.done.wait [#allocation3], 64  }
  0x17   :  { %158 = vsyncadd [#allocation3], 4294967232 }
  0x18   :  { %159 = dma.done.wait [#allocation6], 64  }
  0x19   :  { %160 = vsyncadd [#allocation6], 4294967232  ;;  %v36_v0 = vld [vmem:[#allocation2] sm:$0x1]  ;;  %v37_v1 = vld [vmem:[#allocation5] sm:$0x1] }
  0x1a   :  { %v39_v2 = vld [vmem:[#allocation2 + $0x1] sm:$0x1]  ;;  %v38_v3 = vmul.f32 %v37_v1, %v36_v0  ;;  %v40_v4 = vld [vmem:[#allocation5 + $0x1] sm:$0x1]  ;;  %v45_v5 = vld [vmem:[#allocation2 + $0x2] sm:$0x1] }
  0x1b   :  { %v46_v6 = vld [vmem:[#allocation5 + $0x2] sm:$0x1]  ;;  %v41_v7 = vmul.f32 %v40_v4, %v39_v2  ;;  %v51_v9 = vld [vmem:[#allocation2 + $0x3] sm:$0x1]  ;;  %v52_v10 = vld [vmem:[#allocation5 + $0x3] sm:$0x1] }
  0x1c   :  { %v47_v8 = vmul.f32 %v46_v6, %v45_v5  ;;  %v53_v11 = vmul.f32 %v52_v10, %v51_v9  ;;  %v165_v13 = vmov 0   ;;  %s166_s0 = smov [#allocation7]   ;;  %v167_v18 = vmov 0.0  }
  0x1d   :  { %vm42_vm0 = vcmp.gt.f32.partialorder %v41_v7, %v38_v3  ;;  %s78_s1 = sshll.u32 %s166_s0, 4  ;;  %s79_s1 = int_to_ptr.vmem [resolvable:$true] %s78_s1 }
  0x1e   :  { %v43_v12 = vsel %vm42_vm0, %v41_v7, %v38_v3  ;;  %v44_v14 = vsel %vm42_vm0, 1, %v165_v13  ;;  %s137_s19 = scalar_lea.vmem %s79_s1, 64  ;;  %p142_p11 = scmp.lt.s32.totalorder %s79_s1, %s79_s1 }
  0x1f   :  { %vm48_vm1 = vcmp.gt.f32.partialorder %v47_v8, %v43_v12  ;;  %p138_p10 = scmp.ne.s32.totalorder %s79_s1, %s137_s19  ;;  %p143_p12 = scmp.lt.s32.totalorder %s137_s19, %s137_s19 }
  0x20   :  { %v49_v15 = vsel %vm48_vm1, %v47_v8, %v43_v12  ;;  %v50_v16 = vsel %vm48_vm1, 2, %v44_v14 }
  0x21   :  { %vm54_vm2 = vcmp.gt.f32.partialorder %v53_v11, %v49_v15  ;;  %p144_p13 = por %p143_p12, %p142_p11 }
  0x22   :  { %v55_v17 = vsel %vm54_vm2, 3, %v50_v16 }
  0x23   :  { %vm56_vm3 = vcmp.eq.s32.totalorder %v55_v17, 0  ;;  %vm60_vm4 = vcmp.eq.s32.totalorder %v55_v17, 1  ;;  %vm64_vm5 = vcmp.eq.s32.totalorder %v55_v17, 2  ;;  %vm68_vm6 = vcmp.eq.s32.totalorder %v55_v17, 3  ;;  %p145_p0 = pnand %p144_p13, %p138_p10 }
  0x24   :  { %v88_v19 = vsel %vm56_vm3, 1.0, %v167_v18  ;;  %v89_v20 = vsel %vm60_vm4, 1.0, %v167_v18  ;;  %v90_v21 = vsel %vm64_vm5, 1.0, %v167_v18  ;;  %v91_v22 = vsel %vm68_vm6, 1.0, %v167_v18 }
  0x25   :  { %59 = vst [vmem:[#allocation7] sm:$0x1] %v88_v19  ;;  %63 = vst [vmem:[#allocation7 + $0x1] sm:$0x1] %v89_v20 }
  0x26   :  { %67 = vst [vmem:[#allocation7 + $0x2] sm:$0x1] %v90_v21  ;;  %71 = vst [vmem:[#allocation7 + $0x3] sm:$0x1] %v91_v22 }
  0x27   :  { %148 = shalt.err (!%p145_p0)
}
  0x28   :  { %81 = dma.vmem_to_hbm [thread:$0]  %s79_s1, 64, %s194_s2, [#allocation4]  }
  0x29   :  { %161 = dma.done.wait [#allocation4], 64  }
  0x2a   :  { %162 = vsyncadd [#allocation4], 4294967232 }
  0x2b   :  { %85 = vsyncpa [#allocation3], 1 }
  0x2c   :  { %86 = vsyncpa [#allocation6], 1 }
  0x2d   :  { %87 = vsyncpa [#allocation4], 1 }

</bundles_post_ra>
